<compile_context>
chip_gen: v5e
topology: v5e:2x2
jax: 0.10.0
libtpu: 0.0.40
codegen_flags: <defaults>
</compile_context>

<pallas_src>
import functools
import math

import numpy as np
import jax
import jax.numpy as jnp
from jax import lax
from jax.experimental import pallas as pl
from jax.experimental.pallas import tpu as pltpu


# ----------------------------------------------------------------------------
# generation-aware VMEM budget & H-aware tile selection
# ----------------------------------------------------------------------------
def _vmem_budget_bytes():
    try:
        cap = int(pltpu.get_tpu_info().vmem_capacity_bytes)
    except Exception:
        cap = 64 << 20
    # leave headroom for compiler scratch; cap at 96 MiB on 128 MiB parts,
    # ~48 MiB on v7x's 64 MiB/TC.
    return int(min(cap * 3 // 4, 96 << 20))


def _round_up(a, b):
    return (a + b - 1) // b * b


def _cdiv(a, b):
    return -(-a // b)


def _pick_row_tile(n_rows, n_cols, itemsize, budget, row_tile=None,
                   target_block_bytes=4 << 20):
    """Pick (tile_rows, num_tiles).  Single whole-array block when resident."""
    whole = n_rows * n_cols * itemsize
    if row_tile is None and 5 * whole <= budget:
        return n_rows, 1                       # resident fast path
    row_bytes = max(1, n_cols * itemsize)
    tn = int(target_block_bytes // row_bytes) if row_tile is None else int(row_tile)
    tn = min(tn, int((budget // 6) // row_bytes))   # 2x in + 2x out + headroom
    tn = max(128, (tn // 128) * 128)                # lane/sublane legality
    if tn >= n_rows:
        return n_rows, 1
    return tn, _cdiv(n_rows, tn)


# ----------------------------------------------------------------------------
# graphnorm: two-pass streaming kernel, grid = (2, num_row_tiles)
#   mean[g] = sum_{n in g} x[n] / cnt[g];  c[g] = mean[g] * mean_scale
#   out[n]  = weight * (x[n] - c[g(n)]) / sqrt(E_g[(x-c)^2] + 1e-6) + bias
# ----------------------------------------------------------------------------
def _graphnorm_kernel(g_lo_ref, gid_row_ref, gid_col_ref, invc_ref, x_ref,
                      w_ref, b_ref, ms_ref, o_ref, s12_ref, *, n_valid, gmax):
    p = pl.program_id(0)          # 0 = accumulate stats (+finalize), 1 = normalize
    i = pl.program_id(1)          # row-tile index
    nt = pl.num_programs(1)
    tn, h = x_ref.shape
    g_lo = pl.multiple_of(g_lo_ref[i], 8)     # first graph of this tile (aligned)

    x = x_ref[...].astype(jnp.float32)

    @pl.when(jnp.logical_and(p == 0, i == 0))
    def _init():
        s12_ref[...] = jnp.zeros_like(s12_ref)

    @pl.when(p == 0)
    def _accumulate():
        # mask ragged last tile (partial boundary block reads are unspecified)
        row = i * tn + lax.broadcasted_iota(jnp.int32, (tn, 1), 0)
        xm = jnp.where(row < n_valid, x, 0.0)
        xx = jnp.concatenate([xm, xm * xm], axis=1)                 # (tn, 2h)
        # one-hot only over the <= gmax graphs present in this tile
        g_iota = g_lo + lax.broadcasted_iota(jnp.int32, (gmax, tn), 0)
        onehot = (g_iota == gid_row_ref[...]).astype(jnp.float32)   # (gmax, tn)
        s12_ref[pl.ds(g_lo, gmax), :] += jnp.dot(
            onehot, xx, preferred_element_type=jnp.float32)

        # finalize all per-graph algebra once, at the end of pass 0, so pass-1
        # tiles only read the scratch.
        @pl.when(i == nt - 1)
        def _finalize():
            inv_cnt = invc_ref[...]                       # (bp, 1), 0 for empty
            mean = s12_ref[:, :h] * inv_cnt
            ex2 = s12_ref[:, h:] * inv_cnt
            c = mean * ms_ref[...]
            # E_g[(x - c)^2] = (E[x^2] - mean^2) + (mean - c)^2
            var = (ex2 - mean * mean) + (mean - c) * (mean - c)
            s12_ref[:, :h] = c                                   # per-graph subtrahend
            s12_ref[:, h:] = w_ref[...] * lax.rsqrt(var + 1e-6)  # weight / std

    @pl.when(p == 1)
    def _normalize():
        n_iota = g_lo + lax.broadcasted_iota(jnp.int32, (tn, gmax), 1)
        onehot_t = (n_iota == gid_col_ref[...]).astype(jnp.float32)   # (tn, gmax)
        cs = jnp.dot(onehot_t, s12_ref[pl.ds(g_lo, gmax), :],
                     preferred_element_type=jnp.float32)              # (tn, 2h)
        o_ref[...] = ((x - cs[:, :h]) * cs[:, h:] + b_ref[...]).astype(o_ref.dtype)


def graphnorm_forward(x, batch_num_nodes, weight, bias, mean_scale, *, row_tile=None):
    n, h = x.shape
    b = len(batch_num_nodes)
    budget = _vmem_budget_bytes()
    tn, nt = _pick_row_tile(n, h, x.dtype.itemsize, budget, row_tile)

    # host-side per-tile graph window (batch_num_nodes is host data; gid sorted)
    counts_np = np.asarray(batch_num_nodes, dtype=np.int64)
    starts = np.concatenate([[0], np.cumsum(counts_np)])
    t_first = np.minimum(np.arange(nt, dtype=np.int64) * tn, max(n - 1, 0))
    t_last = np.minimum(np.arange(nt, dtype=np.int64) * tn + tn - 1, max(n - 1, 0))
    g_lo_raw = np.searchsorted(starts, t_first, side="right") - 1
    g_hi_raw = np.searchsorted(starts, t_last, side="right") - 1
    g_lo_np = (g_lo_raw // 8) * 8
    gmax = int(_round_up(int(np.max(g_hi_raw - g_lo_np + 1)), 8))
    bp = int(_round_up(max(b, int(np.max(g_lo_np)) + gmax), 8))

    g_lo_arr = jnp.asarray(g_lo_np, dtype=jnp.int32)              # scalar prefetch

    counts = jnp.asarray(counts_np, dtype=jnp.float32)
    inv = jnp.where(counts > 0, 1.0 / jnp.maximum(counts, 1.0), 0.0)
    inv_counts = jnp.zeros((bp, 1), jnp.float32).at[:b, 0].set(inv)

    gid = jnp.repeat(jnp.arange(b, dtype=jnp.int32),
                     jnp.asarray(counts_np, dtype=jnp.int32),
                     total_repeat_length=n)
    gid_row = gid.reshape(1, n)            # lane-major view (pass 0)
    gid_col = gid.reshape(n, 1)            # sublane-major view (pass 1)

    kernel = functools.partial(_graphnorm_kernel, n_valid=n, gmax=gmax)
    return pl.pallas_call(
        kernel,
        out_shape=jax.ShapeDtypeStruct((n, h), x.dtype),
        grid_spec=pltpu.PrefetchScalarGridSpec(
            num_scalar_prefetch=1,
            grid=(2, nt),
            in_specs=[
                pl.BlockSpec((1, tn), lambda p, i, glo: (0, i)),   # graph ids (lanes)
                pl.BlockSpec((tn, 1), lambda p, i, glo: (i, 0)),   # graph ids (sublanes)
                pl.BlockSpec((bp, 1), lambda p, i, glo: (0, 0)),   # 1 / nodes-per-graph
                pl.BlockSpec((tn, h), lambda p, i, glo: (i, 0)),   # x row tile
                pl.BlockSpec((1, h), lambda p, i, glo: (0, 0)),    # weight
                pl.BlockSpec((1, h), lambda p, i, glo: (0, 0)),    # bias
                pl.BlockSpec((1, h), lambda p, i, glo: (0, 0)),    # mean_scale
            ],
            # pass 0 keeps the output block index at 0 -> no garbage write-backs;
            # pass 1 writes every tile exactly once.
            out_specs=pl.BlockSpec((tn, h), lambda p, i, glo: (i * p, 0)),
            scratch_shapes=[pltpu.VMEM((bp, 2 * h), jnp.float32)],
        ),
        compiler_params=pltpu.CompilerParams(
            dimension_semantics=("arbitrary", "arbitrary"),
            vmem_limit_bytes=budget),
    )(g_lo_arr, gid_row, gid_col, inv_counts, x,
      weight.reshape(1, h), bias.reshape(1, h), mean_scale.reshape(1, h))


# ----------------------------------------------------------------------------
# layernorm (nn.LayerNorm(hidden_dim), eps=1e-5), tiled over rows, parallel
# (note: production H should be a multiple of 128 for full lane occupancy)
# ----------------------------------------------------------------------------
def _layernorm_kernel(x_ref, g_ref, b_ref, o_ref, *, eps):
    x = x_ref[...].astype(jnp.float32)
    mean = jnp.mean(x, axis=-1, keepdims=True)
    var = jnp.mean(jnp.square(x - mean), axis=-1, keepdims=True)
    o_ref[...] = ((x - mean) * lax.rsqrt(var + eps) * g_ref[...]
                  + b_ref[...]).astype(o_ref.dtype)


def layernorm_forward(x, gamma, beta, *, row_tile=None, eps=1e-5):
    n, h = x.shape
    budget = _vmem_budget_bytes()
    tn, nt = _pick_row_tile(n, h, x.dtype.itemsize, budget, row_tile)
    return pl.pallas_call(
        functools.partial(_layernorm_kernel, eps=eps),
        out_shape=jax.ShapeDtypeStruct((n, h), x.dtype),
        grid_spec=pltpu.PrefetchScalarGridSpec(
            num_scalar_prefetch=0,
            grid=(nt,),
            in_specs=[pl.BlockSpec((tn, h), lambda i: (i, 0)),
                      pl.BlockSpec((1, h), lambda i: (0, 0)),
                      pl.BlockSpec((1, h), lambda i: (0, 0))],
            out_specs=pl.BlockSpec((tn, h), lambda i: (i, 0)),
        ),
        compiler_params=pltpu.CompilerParams(
            dimension_semantics=("parallel",),
            vmem_limit_bytes=budget),
    )(x, gamma.reshape(1, h), beta.reshape(1, h))


# ----------------------------------------------------------------------------
# batchnorm (nn.BatchNorm1d training-mode statistics, eps=1e-5)
# two-pass streaming kernel, grid = (2, num_row_tiles); lane-dense packed
# layout (N*H/128, 128) when 128 % H == 0 and N*H % 128 == 0.
# ----------------------------------------------------------------------------
def _batchnorm_kernel(x_ref, g_ref, b_ref, o_ref, s1_ref, s2_ref, *,
                      n_valid_rows, inv_n, eps, fold_k):
    p = pl.program_id(0)
    i = pl.program_id(1)
    nt = pl.num_programs(1)
    tn = x_ref.shape[0]
    h = g_ref.shape[-1]
    x = x_ref[...].astype(jnp.float32)

    @pl.when(jnp.logical_and(p == 0, i == 0))
    def _init():
        s1_ref[...] = jnp.zeros_like(s1_ref)
        s2_ref[...] = jnp.zeros_like(s2_ref)

    @pl.when(p == 0)
    def _accumulate():
        row = i * tn + lax.broadcasted_iota(jnp.int32, (tn, 1), 0)
        xm = jnp.where(row < n_valid_rows, x, 0.0)
        s1_ref[...] += jnp.sum(xm, axis=0, keepdims=True)
        s2_ref[...] += jnp.sum(xm * xm, axis=0, keepdims=True)

        @pl.when(i == nt - 1)
        def _finalize():
            # fold the fold_k packed groups back to per-feature totals
            tot1 = jnp.sum(s1_ref[...].reshape(fold_k, h), axis=0, keepdims=True)
            tot2 = jnp.sum(s2_ref[...].reshape(fold_k, h), axis=0, keepdims=True)
            mean = tot1 * inv_n
            var = tot2 * inv_n - mean * mean          # biased (training) variance
            scale = g_ref[...] * lax.rsqrt(var + eps)
            shift = b_ref[...] - mean * scale
            s1_ref[...] = jnp.tile(scale, (1, fold_k))
            s2_ref[...] = jnp.tile(shift, (1, fold_k))

    @pl.when(p == 1)
    def _normalize():
        o_ref[...] = (x * s1_ref[...] + s2_ref[...]).astype(o_ref.dtype)


def batchnorm_forward(x, gamma, beta, *, row_tile=None, eps=1e-5):
    n, h = x.shape
    budget = _vmem_budget_bytes()

    packed = (h < 128) and (128 % h == 0) and ((n * h) % 128 == 0)
    if packed:
        k = 128 // h
        xk = x.reshape(n * h // 128, 128)     # lane-dense view (free: contiguous)
        cols = 128
    else:
        k = 1
        xk = x
        cols = h
    rows = xk.shape[0]
    tn, nt = _pick_row_tile(rows, cols, x.dtype.itemsize, budget, row_tile)

    out = pl.pallas_call(
        functools.partial(_batchnorm_kernel, n_valid_rows=rows,
                          inv_n=float(1.0 / n), eps=eps, fold_k=k),
        out_shape=jax.ShapeDtypeStruct((rows, cols), x.dtype),
        grid_spec=pltpu.PrefetchScalarGridSpec(
            num_scalar_prefetch=0,
            grid=(2, nt),
            in_specs=[pl.BlockSpec((tn, cols), lambda p, i: (i, 0)),
                      pl.BlockSpec((1, h), lambda p, i: (0, 0)),
                      pl.BlockSpec((1, h), lambda p, i: (0, 0))],
            out_specs=pl.BlockSpec((tn, cols), lambda p, i: (i * p, 0)),
            scratch_shapes=[pltpu.VMEM((1, cols), jnp.float32),
                            pltpu.VMEM((1, cols), jnp.float32)],
        ),
        compiler_params=pltpu.CompilerParams(
            dimension_semantics=("arbitrary", "arbitrary"),
            vmem_limit_bytes=budget),
    )(xk, gamma.reshape(1, h), beta.reshape(1, h))
    return out.reshape(n, h)


# ----------------------------------------------------------------------------
# dispatcher (JAX equivalent of NormLayer.forward(graph, x))
# ----------------------------------------------------------------------------
def norm_layer_forward(norm_type, params, x, batch_num_nodes=None):
    if norm_type == "batchnorm":
        return batchnorm_forward(x, params["weight"], params["bias"])
    if norm_type == "layernorm":
        return layernorm_forward(x, params["weight"], params["bias"])
    if norm_type == "graphnorm":
        return graphnorm_forward(x, batch_num_nodes, params["weight"],
                                 params["bias"], params["mean_scale"])
    raise NotImplementedError(norm_type)


# ----------------------------------------------------------------------------
# pure-JAX references (correctness checks)
# ----------------------------------------------------------------------------
def _graphnorm_ref(x, batch_num_nodes, weight, bias, mean_scale):
    n, _ = x.shape
    b = len(batch_num_nodes)
    counts = jnp.asarray(batch_num_nodes, dtype=jnp.float32)
    seg = jnp.repeat(jnp.arange(b), jnp.asarray(batch_num_nodes),
                     total_repeat_length=n)
    mean = jax.ops.segment_sum(x, seg, num_segments=b) / counts[:, None]
    sub = x - mean[seg] * mean_scale
    var = jax.ops.segment_sum(sub * sub, seg, num_segments=b) / counts[:, None]
    std = jnp.sqrt(var + 1e-6)
    return weight * sub / std[seg] + bias


def _layernorm_ref(x, g, b, eps=1e-5):
    m = jnp.mean(x, axis=-1, keepdims=True)
    v = jnp.mean((x - m) ** 2, axis=-1, keepdims=True)
    return (x - m) / jnp.sqrt(v + eps) * g + b


def _batchnorm_ref(x, g, b, eps=1e-5):
    m = jnp.mean(x, axis=0, keepdims=True)
    v = jnp.mean((x - m) ** 2, axis=0, keepdims=True)
    return (x - m) / jnp.sqrt(v + eps) * g + b


if __name__ == "__main__":
    key = jax.random.PRNGKey(0)
    k1, k2, k3, k4, k5 = jax.random.split(key, 5)
    hidden_dim = 32

    weight = 1.0 + 0.1 * jax.random.normal(k2, (hidden_dim,), jnp.float32)
    bias = 0.1 * jax.random.normal(k3, (hidden_dim,), jnp.float32)
    mean_scale = 1.0 + 0.1 * jax.random.normal(k4, (hidden_dim,), jnp.float32)
    params = {"weight": weight, "bias": bias, "mean_scale": mean_scale}

    # ---- small case (resident single-tile path): 3 graphs, 12 nodes ---------
    batch_num_nodes = [3, 4, 5]
    n_nodes = sum(batch_num_nodes)
    x = jax.random.normal(k1, (n_nodes, hidden_dim), dtype=jnp.float32)

    out_gn = jax.block_until_ready(
        norm_layer_forward("graphnorm", params, x, batch_num_nodes=batch_num_nodes))
    ref_gn = _graphnorm_ref(x, batch_num_nodes, weight, bias, mean_scale)
    assert out_gn.shape == (n_nodes, hidden_dim)
    assert jnp.allclose(out_gn, ref_gn, atol=1e-4, rtol=1e-4)

    out_ln = jax.block_until_ready(norm_layer_forward("layernorm", params, x))
    assert jnp.allclose(out_ln, _layernorm_ref(x, weight, bias), atol=1e-4, rtol=1e-4)

    out_bn = jax.block_until_ready(norm_layer_forward("batchnorm", params, x))
    assert jnp.allclose(out_bn, _batchnorm_ref(x, weight, bias), atol=1e-4, rtol=1e-4)

    # ---- larger ragged case exercising multi-tile grids + boundary masking --
    batch_num_nodes2 = [60, 70, 50, 77]          # N = 257 (not a tile multiple)
    n2 = sum(batch_num_nodes2)
    x2 = jax.random.normal(k5, (n2, hidden_dim), dtype=jnp.float32)
    ref_gn2 = _graphnorm_ref(x2, batch_num_nodes2, weight, bias, mean_scale)

    # resident (auto) path
    out_gn2a = jax.block_until_ready(
        graphnorm_forward(x2, batch_num_nodes2, weight, bias, mean_scale))
    assert jnp.allclose(out_gn2a, ref_gn2, atol=1e-4, rtol=1e-4)

    # forced multi-tile streaming path (row_tile=128 -> 3 ragged tiles)
    out_gn2b = jax.block_until_ready(
        graphnorm_forward(x2, batch_num_nodes2, weight, bias, mean_scale,
                          row_tile=128))
    assert jnp.allclose(out_gn2b, ref_gn2, atol=1e-4, rtol=1e-4)

    out_ln2 = jax.block_until_ready(layernorm_forward(x2, weight, bias, row_tile=128))
    assert jnp.allclose(out_ln2, _layernorm_ref(x2, weight, bias), atol=1e-4, rtol=1e-4)

    out_bn2 = jax.block_until_ready(batchnorm_forward(x2, weight, bias, row_tile=128))
    assert jnp.allclose(out_bn2, _batchnorm_ref(x2, weight, bias), atol=1e-4, rtol=1e-4)

    print("KERNEL_OK")
</pallas_src>

<mosaic_0001>
module attributes {stable_mosaic.version = 11 : i64} {
  func.func @_graphnorm_kernel(%arg0: i32, %arg1: i32, %arg2: memref<1xi32, #tpu.memory_space<smem>>, %arg3: memref<1x12xi32, #tpu.memory_space<vmem>>, %arg4: memref<12x1xi32, #tpu.memory_space<vmem>>, %arg5: memref<8x1xf32, #tpu.memory_space<vmem>>, %arg6: memref<12x32xf32, #tpu.memory_space<vmem>>, %arg7: memref<1x32xf32, #tpu.memory_space<vmem>>, %arg8: memref<1x32xf32, #tpu.memory_space<vmem>>, %arg9: memref<1x32xf32, #tpu.memory_space<vmem>>, %arg10: memref<12x32xf32, #tpu.memory_space<vmem>>, %arg11: memref<8x64xf32, #tpu.memory_space<vmem>>) attributes {dimension_semantics = [#tpu.dimension_semantics<arbitrary>, #tpu.dimension_semantics<arbitrary>], iteration_bounds = array<i64: 2, 1>, scalar_prefetch = 1 : i64, scratch_operands = 1 : i64, tpu.core_type = #tpu.core_type<tc>, window_params = [{transform_indices = @transform_0, window_bounds = array<i64: 1, 12>}, {transform_indices = @transform_1, window_bounds = array<i64: 12, 1>}, {pipeline_mode = #tpu.pipeline_mode<synchronous>, transform_indices = @transform_2, window_bounds = array<i64: 8, 1>}, {transform_indices = @transform_3, window_bounds = array<i64: 12, 32>}, {pipeline_mode = #tpu.pipeline_mode<synchronous>, transform_indices = @transform_4, window_bounds = array<i64: 1, 32>}, {pipeline_mode = #tpu.pipeline_mode<synchronous>, transform_indices = @transform_5, window_bounds = array<i64: 1, 32>}, {pipeline_mode = #tpu.pipeline_mode<synchronous>, transform_indices = @transform_6, window_bounds = array<i64: 1, 32>}, {transform_indices = @transform_7, window_bounds = array<i64: 12, 32>}]} {
    %0 = arith.index_cast %arg1 : i32 to index
    %1 = memref.load %arg2[%0] : memref<1xi32, #tpu.memory_space<smem>>
    %2 = tpu.assume_multiple %1, 8 : i32
    %c0 = arith.constant 0 : index
    %c0_0 = arith.constant 0 : index
    %3 = vector.load %arg6[%c0, %c0_0] : memref<12x32xf32, #tpu.memory_space<vmem>>, vector<12x32xf32>
    %c0_i32 = arith.constant 0 : i32
    %4 = arith.cmpi eq, %arg0, %c0_i32 : i32
    %c0_i32_1 = arith.constant 0 : i32
    %5 = arith.cmpi eq, %arg1, %c0_i32_1 : i32
    %6 = arith.andi %4, %5 : i1
    %7 = arith.extui %6 : i1 to i32
    %c0_i32_2 = arith.constant 0 : i32
    %8 = arith.cmpi ne, %7, %c0_i32_2 : i32
    scf.if %8 {
      %cst = arith.constant 0.000000e+00 : f32
      %15 = vector.broadcast %cst : f32 to vector<8x64xf32>
      %c0_6 = arith.constant 0 : index
      %c0_7 = arith.constant 0 : index
      %16 = vector.load %arg11[%c0_6, %c0_7] : memref<8x64xf32, #tpu.memory_space<vmem>>, vector<8x64xf32>
      tpu.vector_store %arg11[%c0_6, %c0_7], %15 {strides = array<i32>} : memref<8x64xf32, #tpu.memory_space<vmem>>, vector<8x64xf32>,
    } else {
    }
    %c0_i32_3 = arith.constant 0 : i32
    %9 = arith.cmpi eq, %arg0, %c0_i32_3 : i32
    %10 = arith.extui %9 : i1 to i32
    %c0_i32_4 = arith.constant 0 : i32
    %11 = arith.cmpi ne, %10, %c0_i32_4 : i32
    scf.if %11 {
      %c12_i32 = arith.constant 12 : i32
      %15 = arith.muli %arg1, %c12_i32 : i32
      %16 = tpu.iota {dimensions = array<i32: 0>} : vector<12x1xi32>
      %17 = vector.broadcast %15 : i32 to vector<12x1xi32>
      %18 = arith.addi %17, %16 : vector<12x1xi32>
      %c12_i32_6 = arith.constant 12 : i32
      %19 = vector.broadcast %c12_i32_6 : i32 to vector<12x1xi32>
      %20 = arith.cmpi slt, %18, %19 : vector<12x1xi32>
      %cst = arith.constant 0.000000e+00 : f32
      %21 = vector.shape_cast %20 : vector<12x1xi1> to vector<12x1xi1>
      %22 = vector.broadcast %21 : vector<12x1xi1> to vector<12x32xi1>
      %23 = vector.broadcast %cst : f32 to vector<12x32xf32>
      %24 = arith.select %22, %3, %23 : vector<12x32xi1>, vector<12x32xf32>
      %25 = arith.mulf %24, %24 : vector<12x32xf32>
      %26 = tpu.concatenate %24, %25 in 1 : vector<12x32xf32>, vector<12x32xf32> -> vector<12x64xf32>
      %27 = tpu.iota {dimensions = array<i32: 0>} : vector<8x12xi32>
      %28 = vector.broadcast %2 : i32 to vector<8x12xi32>
      %29 = arith.addi %28, %27 : vector<8x12xi32>
      %c0_7 = arith.constant 0 : index
      %c0_8 = arith.constant 0 : index
      %30 = vector.load %arg3[%c0_7, %c0_8] : memref<1x12xi32, #tpu.memory_space<vmem>>, vector<1x12xi32>
      %31 = vector.broadcast %30 : vector<1x12xi32> to vector<8x12xi32>
      %32 = arith.cmpi eq, %29, %31 : vector<8x12xi32>
      %33 = arith.extui %32 : vector<8x12xi1> to vector<8x12xi32>
      %34 = arith.sitofp %33 : vector<8x12xi32> to vector<8x12xf32>
      %35 = arith.index_cast %2 : i32 to index
      %c0_9 = arith.constant 0 : index
      %36 = vector.load %arg11[%35, %c0_9] : memref<8x64xf32, #tpu.memory_space<vmem>>, vector<8x64xf32>
      %cst_10 = arith.constant dense<0.000000e+00> : vector<8x64xf32>
      %37 = tpu.matmul %34, %26, %cst_10 {dimension_numbers = #tpu.dot_dimension_numbers<[1], [0], [0], [1], [0, 0, 1, 1], [], []>} : vector<8x12xf32>, vector<12x64xf32>, vector<8x64xf32> -> vector<8x64xf32>
      %38 = arith.addf %36, %37 : vector<8x64xf32>
      %39 = arith.index_cast %2 : i32 to index
      %c0_11 = arith.constant 0 : index
      %40 = vector.load %arg11[%39, %c0_11] : memref<8x64xf32, #tpu.memory_space<vmem>>, vector<8x64xf32>
      tpu.vector_store %arg11[%39, %c0_11], %38 {strides = array<i32>} : memref<8x64xf32, #tpu.memory_space<vmem>>, vector<8x64xf32>,
      %c0_i32_12 = arith.constant 0 : i32
      %41 = arith.cmpi eq, %arg1, %c0_i32_12 : i32
      %42 = arith.extui %41 : i1 to i32
      %c0_i32_13 = arith.constant 0 : i32
      %43 = arith.cmpi ne, %42, %c0_i32_13 : i32
      scf.if %43 {
        %c0_14 = arith.constant 0 : index
        %c0_15 = arith.constant 0 : index
        %44 = vector.load %arg5[%c0_14, %c0_15] : memref<8x1xf32, #tpu.memory_space<vmem>>, vector<8x1xf32>
        %c0_16 = arith.constant 0 : index
        %c0_17 = arith.constant 0 : index
        %45 = vector.load %arg11[%c0_16, %c0_17] : memref<8x64xf32, #tpu.memory_space<vmem>>, vector<8x32xf32>
        %46 = vector.broadcast %44 : vector<8x1xf32> to vector<8x32xf32>
        %47 = arith.mulf %45, %46 : vector<8x32xf32>
        %c0_18 = arith.constant 0 : index
        %c32 = arith.constant 32 : index
        %48 = vector.load %arg11[%c0_18, %c32] : memref<8x64xf32, #tpu.memory_space<vmem>>, vector<8x32xf32>
        %49 = vector.broadcast %44 : vector<8x1xf32> to vector<8x32xf32>
        %50 = arith.mulf %48, %49 : vector<8x32xf32>
        %c0_19 = arith.constant 0 : index
        %c0_20 = arith.constant 0 : index
        %51 = vector.load %arg9[%c0_19, %c0_20] : memref<1x32xf32, #tpu.memory_space<vmem>>, vector<1x32xf32>
        %52 = vector.broadcast %51 : vector<1x32xf32> to vector<8x32xf32>
        %53 = arith.mulf %47, %52 : vector<8x32xf32>
        %54 = arith.mulf %47, %47 : vector<8x32xf32>
        %55 = arith.subf %50, %54 : vector<8x32xf32>
        %56 = arith.subf %47, %53 : vector<8x32xf32>
        %57 = arith.subf %47, %53 : vector<8x32xf32>
        %58 = arith.mulf %56, %57 : vector<8x32xf32>
        %59 = arith.addf %55, %58 : vector<8x32xf32>
        %c0_21 = arith.constant 0 : index
        %c0_22 = arith.constant 0 : index
        %60 = vector.load %arg11[%c0_21, %c0_22] : memref<8x64xf32, #tpu.memory_space<vmem>>, vector<8x32xf32>
        tpu.vector_store %arg11[%c0_21, %c0_22], %53 {strides = array<i32>} : memref<8x64xf32, #tpu.memory_space<vmem>>, vector<8x32xf32>,
        %c0_23 = arith.constant 0 : index
        %c0_24 = arith.constant 0 : index
        %61 = vector.load %arg7[%c0_23, %c0_24] : memref<1x32xf32, #tpu.memory_space<vmem>>, vector<1x32xf32>
        %cst_25 = arith.constant 9.99999997E-7 : f32
        %62 = vector.broadcast %cst_25 : f32 to vector<8x32xf32>
        %63 = arith.addf %59, %62 : vector<8x32xf32>
        %64 = math.rsqrt %63 : vector<8x32xf32>
        %65 = vector.broadcast %61 : vector<1x32xf32> to vector<8x32xf32>
        %66 = arith.mulf %65, %64 : vector<8x32xf32>
        %c0_26 = arith.constant 0 : index
        %c32_27 = arith.constant 32 : index
        %67 = vector.load %arg11[%c0_26, %c32_27] : memref<8x64xf32, #tpu.memory_space<vmem>>, vector<8x32xf32>
        tpu.vector_store %arg11[%c0_26, %c32_27], %66 {strides = array<i32>} : memref<8x64xf32, #tpu.memory_space<vmem>>, vector<8x32xf32>,
      } else {
      }
    } else {
    }
    %c1_i32 = arith.constant 1 : i32
    %12 = arith.cmpi eq, %arg0, %c1_i32 : i32
    %13 = arith.extui %12 : i1 to i32
    %c0_i32_5 = arith.constant 0 : i32
    %14 = arith.cmpi ne, %13, %c0_i32_5 : i32
    scf.if %14 {
      %15 = tpu.iota {dimensions = array<i32: 1>} : vector<12x8xi32>
      %16 = vector.broadcast %2 : i32 to vector<12x8xi32>
      %17 = arith.addi %16, %15 : vector<12x8xi32>
      %c0_6 = arith.constant 0 : index
      %c0_7 = arith.constant 0 : index
      %18 = vector.load %arg4[%c0_6, %c0_7] : memref<12x1xi32, #tpu.memory_space<vmem>>, vector<12x1xi32>
      %19 = vector.broadcast %18 : vector<12x1xi32> to vector<12x8xi32>
      %20 = arith.cmpi eq, %17, %19 : vector<12x8xi32>
      %21 = arith.extui %20 : vector<12x8xi1> to vector<12x8xi32>
      %22 = arith.sitofp %21 : vector<12x8xi32> to vector<12x8xf32>
      %23 = arith.index_cast %2 : i32 to index
      %c0_8 = arith.constant 0 : index
      %24 = vector.load %arg11[%23, %c0_8] : memref<8x64xf32, #tpu.memory_space<vmem>>, vector<8x64xf32>
      %cst = arith.constant dense<0.000000e+00> : vector<12x64xf32>
      %25 = tpu.matmul %22, %24, %cst {dimension_numbers = #tpu.dot_dimension_numbers<[1], [0], [0], [1], [0, 0, 1, 1], [], []>} : vector<12x8xf32>, vector<8x64xf32>, vector<12x64xf32> -> vector<12x64xf32>
      %26 = vector.extract_strided_slice %25 {offsets = [0, 0], sizes = [12, 32], strides = [1, 1]} : vector<12x64xf32> to vector<12x32xf32>
      %27 = arith.subf %3, %26 : vector<12x32xf32>
      %28 = vector.extract_strided_slice %25 {offsets = [0, 32], sizes = [12, 32], strides = [1, 1]} : vector<12x64xf32> to vector<12x32xf32>
      %29 = arith.mulf %27, %28 : vector<12x32xf32>
      %c0_9 = arith.constant 0 : index
      %c0_10 = arith.constant 0 : index
      %30 = vector.load %arg8[%c0_9, %c0_10] : memref<1x32xf32, #tpu.memory_space<vmem>>, vector<1x32xf32>
      %31 = vector.broadcast %30 : vector<1x32xf32> to vector<12x32xf32>
      %32 = arith.addf %29, %31 : vector<12x32xf32>
      %c0_11 = arith.constant 0 : index
      %c0_12 = arith.constant 0 : index
      %33 = vector.load %arg10[%c0_11, %c0_12] : memref<12x32xf32, #tpu.memory_space<vmem>>, vector<12x32xf32>
      tpu.vector_store %arg10[%c0_11, %c0_12], %32 {strides = array<i32>} : memref<12x32xf32, #tpu.memory_space<vmem>>, vector<12x32xf32>,
    } else {
    }
    return
  }
  func.func @transform_0(%arg0: i32, %arg1: i32, %arg2: memref<1xi32, #tpu.memory_space<smem>>) -> (i32, i32) {
    %c0_i32 = arith.constant 0 : i32
    %c0_i32_0 = arith.constant 0 : i32
    return %c0_i32, %arg1 : i32, i32
  }
  func.func @transform_1(%arg0: i32, %arg1: i32, %arg2: memref<1xi32, #tpu.memory_space<smem>>) -> (i32, i32) {
    %c0_i32 = arith.constant 0 : i32
    %c0_i32_0 = arith.constant 0 : i32
    return %arg1, %c0_i32 : i32, i32
  }
  func.func @transform_2(%arg0: i32, %arg1: i32, %arg2: memref<1xi32, #tpu.memory_space<smem>>) -> (i32, i32) {
    %c0_i32 = arith.constant 0 : i32
    %c0_i32_0 = arith.constant 0 : i32
    %c0_i32_1 = arith.constant 0 : i32
    return %c0_i32, %c0_i32_0 : i32, i32
  }
  func.func @transform_3(%arg0: i32, %arg1: i32, %arg2: memref<1xi32, #tpu.memory_space<smem>>) -> (i32, i32) {
    %c0_i32 = arith.constant 0 : i32
    %c0_i32_0 = arith.constant 0 : i32
    return %arg1, %c0_i32 : i32, i32
  }
  func.func @transform_4(%arg0: i32, %arg1: i32, %arg2: memref<1xi32, #tpu.memory_space<smem>>) -> (i32, i32) {
    %c0_i32 = arith.constant 0 : i32
    %c0_i32_0 = arith.constant 0 : i32
    %c0_i32_1 = arith.constant 0 : i32
    return %c0_i32, %c0_i32_0 : i32, i32
  }
  func.func @transform_5(%arg0: i32, %arg1: i32, %arg2: memref<1xi32, #tpu.memory_space<smem>>) -> (i32, i32) {
    %c0_i32 = arith.constant 0 : i32
    %c0_i32_0 = arith.constant 0 : i32
    %c0_i32_1 = arith.constant 0 : i32
    return %c0_i32, %c0_i32_0 : i32, i32
  }
  func.func @transform_6(%arg0: i32, %arg1: i32, %arg2: memref<1xi32, #tpu.memory_space<smem>>) -> (i32, i32) {
    %c0_i32 = arith.constant 0 : i32
    %c0_i32_0 = arith.constant 0 : i32
    %c0_i32_1 = arith.constant 0 : i32
    return %c0_i32, %c0_i32_0 : i32, i32
  }
  func.func @transform_7(%arg0: i32, %arg1: i32, %arg2: memref<1xi32, #tpu.memory_space<smem>>) -> (i32, i32) {
    %0 = arith.muli %arg1, %arg0 : i32
    %c0_i32 = arith.constant 0 : i32
    %c0_i32_0 = arith.constant 0 : i32
    return %0, %c0_i32 : i32, i32
  }
}

</mosaic_0001>

<bundles_post_ra>
// kernel: tpu_custom_call.1
= control target key start
LH: loop header
LB: loop body
LE: loop exit
PB: predicated region body
PF: predicated region fallthrough
CT: control target
= control target key end

     0   :  { %s952_s0 = inlined_call_operand.<no memory space> [shape: s32[1], index: 0, kind: input, shape index: {}]   ;;  %s953_s1 = inlined_call_operand.vmem [shape: s32[1,12], index: 1, kind: input, shape index: {}]   ;;  %s954_s2 = inlined_call_operand.vmem [shape: s32[12,1], index: 2, kind: input, shape index: {}]   ;;  %s955_s3 = inlined_call_operand.vmem [shape: f32[8,1], index: 3, kind: input, shape index: {}]   ;;  %s956_s4 = inlined_call_operand.vmem [shape: f32[12,32], index: 4, kind: input, shape index: {}]   ;;  %s957_s5 = inlined_call_operand.vmem [shape: f32[1,32], index: 5, kind: input, shape index: {}]   ;;  %s958_s6 = inlined_call_operand.vmem [shape: f32[1,32], index: 6, kind: input, shape index: {}]   ;;  %s959_s7 = inlined_call_operand.vmem [shape: f32[1,32], index: 7, kind: input, shape index: {}]   ;;  %s960_s8 = inlined_call_operand.hbm [shape: f32[12,32], index: 8, kind: output, shape index: {}]  }
   0x1   :  { %13 = sst [smem:[#allocation4]] %s952_s0 }
   0x2   :  { %14 = vsyncpa [#allocation6], 0 }
   0x3   :  { %16 = vsyncpa [#allocation6 + $0x1], 0  ;;  %s859_s29 = smov 0   ;;  %s861_s30 = smov 0  }
   0x4   :  { %s863_s9 = smov 0  }
   0x5 LB: > { %s666_s0 = sadd.s32 4294967295, %s798_s9   ;;  %s667_s10 = sadd.s32 4294967294, %s798_s9   ;;  %s798_s9 = sphi %s863_s9, %s22_s9   ;;  %s794_s30 = sphi %s861_s30, %s962_s30   ;;  %s790_s29 = sphi %s859_s29, %s961_s29  }
   0x6   : > { %s34_s11 = sadd.s32 1, %s794_s30  ;;  %p672_p0 = scmp.ge.s32.totalorder %s798_s9, 1 }
   0x7   : > { %p36_p1 = scmp.ge.s32.totalorder %s34_s11, 2  ;;  %p276_p2 = scmp.lt.s32.totalorder %s798_s9, 3 }
   0x9   : > { %s964_s11 = smov (%p36_p1, %s34_s11), 0  ;;  %p277_p3 = pnand %p672_p0, %p276_p2 }
   0xa   : > { %s881_s12 = sld [smem:[#allocation4]] (!%p277_p3)  ;;  %p336_p4 = scmp.eq.s32.totalorder (!%p277_p3), %s790_s29, 0 }
   0xb   : > { %280 = sbr.rel (%p277_p3) target bundleno = 1035 (0x40b), region = 48 }
  0x10   : > { %v886_v0 = vld [vmem:[%s956_s4] sm:$0xff]  ;;  %v891_v1 = vld [vmem:[%s956_s4 + $0x8] sm:$0xf]  ;;  %341 = sbr.rel (!%p336_p4) target bundleno = 21 (0x15), region = 52  ;;  %vm342_vm0 = vcmask (%p336_p4), 523264   ;;  %v800_v2 = vmov (%p336_p4), 0.0  }
  0x11   : > { %343 = vst.msk [vmem:[#allocation2] sm:$0xff] (%p336_p4), %vm342_vm0, %v800_v2 }
  0x15 PF: > { %p674_p5 = scmp.ne.s32.totalorder %s790_s29, 0 }
  0x16   : > { %s801_s17 = smov (!%p674_p5), 32   ;;  %s382_s22 = scalar_lea.vmem (!%p674_p5), [#allocation2], %s881_s12 }
  0x17   : > { %346 = sbr.rel (%p674_p5) target bundleno = 651 (0x28b), region = 56  ;;  %s804_s25 = smov (!%p674_p5), 96  }
  0x1c   : > { %v348_v3 = vlaneseq  ;;  %v362_v8 = vmul.f32 %v886_v0, %v886_v0  ;;  %v418_v9 = vld [vmem:[%s955_s3] sm:$0xff]  ;;  %v802_v10 = vmov 0   ;;  %vm372_vm2 = vcmask 261120  }
  0x1d   : > { %735 = vset.pattern.permute.xlu1 %v802_v10  ;;  %736 = vset.pattern.permute.xlu0 %v802_v10  ;;  %v375_v11 = vstv %s881_s12  ;;  %vm388_vm3 = vcmask 1043456   ;;  %v737_v15 = vld [vmem:[%s953_s1] ss:$0 sm:$0xff]  ;;  %v803_v17 = vmov 0.0   ;;  %vm384_vm5 = vcmask 97280  }
  0x1e   : > { %v349_v4 = vshrl.u32 %v348_v3, 7  ;;  %422 = vperm.xlu1 %735, %v418_v9   ;;  %v383_v20 = vld [vmem:[%s382_s22] sm:$0xff]  ;;  %vm413_vm6 = vcmask 523264   ;;  %vm469_vm10 = vcmask 523520  }
  0x1f   : > { %v738_v24 = vld [vmem:[%s959_s7] ss:$0 sm:$0xff] }
  0x20   : > { %v350_v5 = vadd.s32 8, %v349_v4  ;;  %v376_v14 = vadd.s32 %v375_v11, %v349_v4  ;;  %v739_v43 = vld [vmem:[%s957_s5] ss:$0 sm:$0xff] }
  0x22   : > { %vm355_vm1 = vcmp.lt.s32.totalorder %v350_v5, 12  ;;  %vm379_vm4 = vcmp.eq.s32.totalorder %v376_v14, %v737_v15 }
  0x23   : > { %v361_v6 = vsel %vm355_vm1, %v891_v1, 0.0  ;;  %v675_v18 = vsel %vm379_vm4, 1.0, %v803_v17 }
  0x24   : > { %v363_v7 = vmul.f32 %v361_v6, %v361_v6 }
  0x26   : > { %368 = vrot.lane.b32.xlu0 %v363_v7, %s801_s17 }
  0x2e   : > { %366 = vrot.lane.b32.xlu0 %v362_v8, %s801_s17 }
  0x90   : > { %v423_v23 = vpop.permute.xlu1 %422 }
  0x98   : > { %v369_v12 = vpop.permute.xlu0 %368 }
  0x99   : > { %v374_v13 = vsel %vm372_vm2, %v361_v6, %v369_v12 }
  0x9a   : > { %676 = vmatpush.msk.msra.mxu0 %vm388_vm3, %v374_v13 }
  0xa0   : > { %v367_v16 = vpop.permute.xlu0 %366 }
  0xa1   : > { %v373_v19 = vsel %vm372_vm2, %v886_v0, %v367_v16 }
  0xa2   : > { %407 = vmatpush.msra.mxu0 %v373_v19 }
  0xa3   : > { %677 = vmatmul.msk.f32.vlgmr.msra.gmra.mxu0 %vm384_vm5, %v675_v18 }
 0x120   : > { %v409_v21 = vpop.f32.mrf.mxu0 }
 0x121   : > { %v412_v22 = vadd.f32 %v409_v21, %v383_v20 }
 0x123   : > { %414 = vst.msk [vmem:[%s382_s22] sm:$0xff] %vm413_vm6, %v412_v22 }
 0x12a   : > { %v419_v25 = vld [vmem:[#allocation2] sm:$0xff] }
 0x12b   : > { %v425_v26 = vmul.f32 %v423_v23, %v419_v25 }
 0x12d   : > { %v431_v27 = vmul.f32 %v425_v26, %v425_v26  ;;  %v430_v28 = vmul.f32 %v738_v24, %v425_v26 }
 0x12f   : > { %433 = vrot.lane.b32.xlu1 %v431_v27, %s801_s17  ;;  %v437_v29 = vsub.f32 %v425_v26, %v430_v28  ;;  %444 = vst.msk [vmem:[#allocation2] sm:$0xff] %vm372_vm2, %v430_v28 }
 0x131   : > { %v438_v30 = vmul.f32 %v437_v29, %v437_v29 }
 0x133   : > { %440 = vrot.lane.b32.xlu2 %v438_v30, %s801_s17 }
 0x18d   : > { %v441_v33 = vpop.permute.xlu2 %440 }
 0x1a1   : > { %v434_v31 = vpop.permute.xlu1 %433 }
 0x1a2   : > { %v436_v32 = vsub.f32 %v425_v26, %v434_v31 }
 0x1a4   : > { %v443_v34 = vadd.f32 %v441_v33, %v436_v32 }
 0x1a6   : > { %v446_v35 = vadd.f32 1e-06, %v443_v34 }
 0x1a8   : > { %740 = vrsqrt.f32 %v446_v35  ;;  %vm453_vm8 = vweird.f32 %v446_v35 }
 0x1ae   : > { %v741_v36 = vpop.eup %740 }
 0x1af   : > { %v448_v37 = vmul.f32 %v741_v36, %v446_v35  ;;  %vm454_vm7 = vweird.f32 %v741_v36 }
 0x1b0   : > { %vm455_vm9 = vmor %vm453_vm8, %vm454_vm7 }
 0x1b1   : > { %v449_v38 = vmul.f32 %v741_v36, %v448_v37 }
 0x1b3   : > { %v450_v39 = vmul.f32 0.5, %v449_v38 }
 0x1b5   : > { %v451_v40 = vsub.f32 1.5, %v450_v39 }
 0x1b7   : > { %v452_v41 = vmul.f32 %v741_v36, %v451_v40 }
 0x1b9   : > { %v456_v42 = vsel %vm455_vm9, %v741_v36, %v452_v41 }
 0x1ba   : > { %461 = vrot.lane.b32.xlu2 %v456_v42, %s804_s25 }
 0x214   : > { %v462_v44 = vpop.permute.xlu2 %461 }
 0x215   : > { %v464_v45 = vmul.f32 %v739_v43, %v462_v44 }
 0x217   : > { %466 = vrot.lane.b32.xlu0 %v464_v45, %s801_s17 }
 0x289   : > { %v467_v46 = vpop.permute.xlu0 %466 }
 0x28a   : > { %470 = vst.msk [vmem:[#allocation2] sm:$0xff] %vm469_vm10, %v467_v46 }
 0x28b PF: > { %p678_p6 = scmp.ne.s32.totalorder %s790_s29, 1 }
 0x28c   : > { %s493_s16 = scalar_lea.vmem (!%p678_p6), [#allocation2], %s881_s12  ;;  %s807_s29 = smov (!%p678_p6), 96  }
 0x28d   : > { %474 = sbr.rel (%p678_p6) target bundleno = 1031 (0x407), region = 64 }
 0x292   : > { %v479_v47 = vld [vmem:[%s954_s2] sm:$0xff]  ;;  %v805_v48 = vmov 0   ;;  %v480_v49 = vld [vmem:[%s954_s2 + $0x8] sm:$0xf]  ;;  %v475_v51 = vlaneseq  ;;  %v477_v53 = vstv %s881_s12  ;;  %vm495_vm11 = vcmask 64512  }
 0x293   : > { %742 = vset.pattern.permute.xlu0 %v805_v48  ;;  %v494_v50 = vld [vmem:[%s493_s16] sm:$0xff]  ;;  %v806_v56 = vmov 0.0   ;;  %vm543_vm14 = vcmask 261120   ;;  %vm545_vm15 = vcmask 257024  }
 0x294   : > { %482 = vperm.xlu0 %742, %v479_v47   ;;  %517 = vmatpush.msra.mxu0 %v494_v50  ;;  %v476_v52 = vand.u32 127, %v475_v51  ;;  %v743_v63 = vld [vmem:[%s958_s6] ss:$0 sm:$0xff] }
 0x295   : > { %688 = vmatpush.msra.mxu1 %v494_v50 }
 0x296   : > { %v478_v54 = vadd.s32 %v477_v53, %v476_v52 }
 0x29c   : > { %485 = vperm.xlu0 %742, %v480_v49  }
 0x306   : > { %v483_v55 = vpop.permute.xlu0 %482 }
 0x307   : > { %vm487_vm12 = vcmp.eq.s32.totalorder %v478_v54, %v483_v55 }
 0x308   : > { %v679_v57 = vsel %vm487_vm12, 1.0, %v806_v56 }
 0x309   : > { %681 = vmatmul.msk.f32.vlgmr.msra.gmra.mxu0 %vm495_vm11, %v679_v57 }
 0x30e   : > { %v486_v58 = vpop.permute.xlu0 %485 }
 0x30f   : > { %vm488_vm13 = vcmp.eq.s32.totalorder %v478_v54, %v486_v58 }
 0x310   : > { %v680_v59 = vsel %vm488_vm13, 1.0, %v806_v56 }
 0x311   : > { %682 = vmatmul.msk.f32.vlgmr.msra.gmra.mxu1 %vm495_vm11, %v680_v59 }
 0x386   : > { %v519_v60 = vpop.f32.mrf.mxu0 }
 0x387   : > { %529 = vrot.lane.b32.xlu1 %v519_v60, %s807_s29  ;;  %v525_v62 = vsub.f32 %v886_v0, %v519_v60 }
 0x38e   : > { %v522_v61 = vpop.f32.mrf.mxu1 }
 0x38f   : > { %531 = vrot.lane.b32.xlu1 %v522_v61, %s807_s29  ;;  %v526_v5 = vsub.f32 %v891_v1, %v522_v61 }
 0x3f9   : > { %v530_v2 = vpop.permute.xlu1 %529 }
 0x3fa   : > { %v535_v3 = vmul.f32 %v530_v2, %v525_v62 }
 0x3fc   : > { %v541_v4 = vadd.f32 %v743_v63, %v535_v3 }
 0x3fe   : > { %544 = vst.msk [vmem:[#allocation5] sm:$0xff] %vm543_vm14, %v541_v4 }
 0x401   : > { %v532_v6 = vpop.permute.xlu1 %531 }
 0x402   : > { %v536_v7 = vmul.f32 %v532_v6, %v526_v5 }
 0x404   : > { %v542_v8 = vadd.f32 %v743_v63, %v536_v7 }
 0x406   : > { %546 = vst.msk [vmem:[#allocation5 + $0x8] sm:$0xf] %vm545_vm15, %v542_v8 }
 0x407 PF: > { %p697_p7 = scmp.eq.s32.totalorder %s666_s0, 1  ;;  %s563_s20 = sshll.u32 %s960_s8, 4  ;;  %s564_s20 = int_to_ptr.hbm [resolvable:$true] %s563_s20 }
 0x408   : > { %s808_s21 = smov [#allocation5]   ;;  %s809_s23 = smov 128  }
 0x409   : > { %s561_s22 = sshll.u32 %s808_s21, 4  ;;  %s810_s24 = smov 8   ;;  %s562_s22 = int_to_ptr.vmem [resolvable:$true] %s561_s22 }
 0x40a   : > { %690 = dma.vmem_to_hbm [thread:$0]  (%p697_p7), %s562_s22, 256, %s564_s20, [#allocation6], %s809_s23, %s809_s23, %s810_s24  }
 0x40b PF: > { %p698_p8 = scmp.ge.s32.totalorder %s798_s9, 2  ;;  %p699_p9 = scmp.eq.s32.totalorder %s667_s10, 1 }
 0x40d   : > { %p694_p10 = pnand %p699_p9, %p698_p8 }
 0x40f   : > { %p695_p11 = pneg %p694_p10 }
 0x411   : > { %785 = dma.done.wait (%p695_p11), [#allocation6], 256  }
 0x412   : > { %787 = vsyncadd (%p695_p11), [#allocation6], 4294967040  ;;  %s22_s9 = sadd.s32 1, %s798_s9   ;;  %s961_s29 = smov %s794_s30 }
 0x413   : > { %p19_p12 = scmp.ge.s32.totalorder %s22_s9, 4   ;;  %s962_s30 = smov %s964_s11 }
 0x415   :  { %21 = sbr.rel (!%p19_p12) target bundleno = 5 (0x5), region = 107 }
 0x41a   :  { %585 = vsyncpa [#allocation6], 1 }
 0x41b   :  { %587 = vsyncpa [#allocation6 + $0x1], 1 }

</bundles_post_ra>
